<compile_context>
chip_gen: v6e
topology: v6e:2x2x1
jax: 0.10.0
libtpu: 0.0.40
codegen_flags: <defaults>
</compile_context>

<pallas_src>
import math

import jax
import jax.numpy as jnp
from jax.experimental import pallas as pl
from jax.experimental.pallas import tpu as pltpu


def _copy_kernel(x_ref, o_ref):
    # Straight tiled copy of the (already row-major-flattened) stream.
    o_ref[...] = x_ref[...]


# Candidate lane widths: large multiples of 128, widest first.
_LANE_WIDTHS = (4096, 2048, 1024, 512, 256, 128)


def flatten_pallas(x, *, target_block_bytes=2 * 1024 * 1024):
    """Pallas equivalent of torch Flatten: (B, ...) -> (B, prod(...))."""
    B = x.shape[0]
    F = math.prod(x.shape[1:]) if x.ndim > 1 else 1
    N = B * F
    itemsize = jnp.dtype(x.dtype).itemsize
    bytes_accessed = 2 * N * itemsize  # one HBM read + one HBM write

    # TODO(synk): in a real model, prefer returning jnp.reshape(x, (B, F))
    # directly (metadata-only) or fusing the flatten into the consumer's
    # BlockSpec index_map; the copy below is only for when a materialized
    # buffer is explicitly required.

    # Pick the widest lane dim that evenly divides the element count.
    lane_w = next((w for w in _LANE_WIDTHS if N % w == 0), None)

    if lane_w is None:
        # Oddball size (not a multiple of 128): copy the whole (B, F) view as
        # a single block (full-array blocks are exempt from the (8,128) rule).
        out = pl.pallas_call(
            _copy_kernel,
            out_shape=jax.ShapeDtypeStruct((B, F), x.dtype),
            input_output_aliases={0: 0},
            cost_estimate=pl.CostEstimate(
                flops=0, transcendentals=0, bytes_accessed=bytes_accessed),
        )(jnp.reshape(x, (B, F)))
        return out

    rows = N // lane_w
    # Row tile sized for ~target_block_bytes per block, multiple of 8 sublanes.
    row_tile = max(8, (target_block_bytes // (lane_w * itemsize)) // 8 * 8)
    if rows <= row_tile:
        row_tile = rows  # one block covers all rows (full-dim block is legal)
    grid = (pl.cdiv(rows, row_tile),)

    # Zero-cost, row-major view: same element order as torch `.view(B, -1)`
    # on a contiguous NCHW tensor.
    xs = jnp.reshape(x, (rows, lane_w))

    out = pl.pallas_call(
        _copy_kernel,
        out_shape=jax.ShapeDtypeStruct((rows, lane_w), x.dtype),
        grid=grid,
        in_specs=[pl.BlockSpec((row_tile, lane_w), lambda i: (i, 0))],
        out_specs=pl.BlockSpec((row_tile, lane_w), lambda i: (i, 0)),
        input_output_aliases={0: 0},   # allow buffer donation
        cost_estimate=pl.CostEstimate(
            flops=0, transcendentals=0, bytes_accessed=bytes_accessed),
        compiler_params=pltpu.CompilerParams(
            # Parallel axis: sharded across the 2 TensorCores on v7x,
            # harmless on v5e/v6e (1 TC).
            dimension_semantics=("parallel",),
        ),
    )(xs)

    return jnp.reshape(out, (B, F))


if __name__ == "__main__":
    key = jax.random.PRNGKey(0)

    # Small NCHW input consistent with an AlphaZero conv trunk output.
    x = jax.random.normal(key, (2, 4, 16, 16), dtype=jnp.float32)
    out = jax.block_until_ready(flatten_pallas(x))

    ref = jnp.reshape(x, (x.shape[0], -1))  # torch `x.view(x.size(0), -1)`
    assert out.shape == (2, 4 * 16 * 16), out.shape
    assert out.dtype == x.dtype, out.dtype
    assert jnp.array_equal(out, ref), "mismatch vs reference flatten"

    # Second case exercising the multi-block streaming path (partial last
    # block included) by shrinking the per-block budget.
    x2 = jax.random.normal(jax.random.PRNGKey(1), (3, 4, 20, 16),
                           dtype=jnp.float32)
    out2 = jax.block_until_ready(
        flatten_pallas(x2, target_block_bytes=8 * 1024))
    ref2 = jnp.reshape(x2, (x2.shape[0], -1))
    assert out2.shape == ref2.shape, out2.shape
    assert jnp.array_equal(out2, ref2), "mismatch vs reference flatten (case 2)"

    print("KERNEL_OK")
</pallas_src>

<mosaic_0001>
module attributes {stable_mosaic.version = 11 : i64} {
  func.func @_copy_kernel(%arg0: i32, %arg1: memref<1x2048xf32, #tpu.memory_space<vmem>>, %arg2: memref<1x2048xf32, #tpu.memory_space<vmem>>) attributes {dimension_semantics = [#tpu.dimension_semantics<parallel>], iteration_bounds = array<i64: 1>, scalar_prefetch = 0 : i64, scratch_operands = 0 : i64, tpu.core_type = #tpu.core_type<tc>, window_params = [{transform_indices = @transform_0, window_bounds = array<i64: 1, 2048>}, {transform_indices = @transform_1, window_bounds = array<i64: 1, 2048>}]} {
    %c0 = arith.constant 0 : index
    %c0_0 = arith.constant 0 : index
    %0 = vector.load %arg1[%c0, %c0_0] : memref<1x2048xf32, #tpu.memory_space<vmem>>, vector<1x2048xf32>
    %c0_1 = arith.constant 0 : index
    %c0_2 = arith.constant 0 : index
    %1 = vector.load %arg2[%c0_1, %c0_2] : memref<1x2048xf32, #tpu.memory_space<vmem>>, vector<1x2048xf32>
    tpu.vector_store %arg2[%c0_1, %c0_2], %0 {strides = array<i32>} : memref<1x2048xf32, #tpu.memory_space<vmem>>, vector<1x2048xf32>,
    return
  }
  func.func @transform_0(%arg0: i32) -> (i32, i32) {
    %c0_i32 = arith.constant 0 : i32
    %c0_i32_0 = arith.constant 0 : i32
    return %arg0, %c0_i32 : i32, i32
  }
  func.func @transform_1(%arg0: i32) -> (i32, i32) {
    %c0_i32 = arith.constant 0 : i32
    %c0_i32_0 = arith.constant 0 : i32
    return %arg0, %c0_i32 : i32, i32
  }
}

</mosaic_0001>

<bundles_post_ra>
// kernel: tpu_custom_call.1
= control target key start
LH: loop header
LB: loop body
LE: loop exit
PB: predicated region body
PF: predicated region fallthrough
CT: control target
= control target key end

     0   :  { %6 = vsyncpa [#allocation3], 0  ;;  %s104_s0 = inlined_call_operand.hbm [shape: f32[1,2048], index: 0, kind: input, shape index: {}, may-alias: {0,1}]   ;;  %s105_s1 = inlined_call_operand.hbm [shape: f32[1,2048], index: 1, kind: output, shape index: {}, may-alias: {0,1}]  }
   0x1   :  { %7 = vsyncpa [#allocation4], 0  ;;  %s86_s6 = smov [#allocation2]  }
   0x2   :  { %s14_s7 = sshll.u32 %s86_s6, 4  ;;  %s15_s7 = int_to_ptr.vmem [resolvable:$true] %s14_s7 }
   0x3   :  { %s50_s8 = scalar_lea.vmem %s15_s7, 256  ;;  %p55_p1 = scmp.lt.s32.totalorder %s15_s7, %s15_s7 }
   0x4   :  { %p51_p0 = scmp.ne.s32.totalorder %s15_s7, %s50_s8  ;;  %p56_p2 = scmp.lt.s32.totalorder %s50_s8, %s50_s8 }
   0x6   :  { %p57_p3 = por %p56_p2, %p55_p1 }
   0x8   :  { %p58_p4 = pnand %p57_p3, %p51_p0 }
   0xa   :  { %61 = shalt.err (!%p58_p4)
}
   0xb   :  { %17 = dma.hbm_to_vmem [thread:$0]  %s104_s0, 256, %s15_s7, [#allocation3]  }
   0xc   :  { %82 = dma.done.wait [#allocation3], 256  }
   0xd   :  { %83 = vsyncadd [#allocation3], 4294967040  ;;  %s87_s11 = smov [#allocation5]   ;;  %v21_v0 = vld [vmem:[#allocation2] sm:$0xff]  ;;  %v22_v1 = vld [vmem:[#allocation2 + $0x8] sm:$0xff] }
   0xe   :  { %s31_s12 = sshll.u32 %s87_s11, 4  ;;  %23 = vst [vmem:[#allocation5] sm:$0xff] %v21_v0  ;;  %24 = vst [vmem:[#allocation5 + $0x8] sm:$0xff] %v22_v1  ;;  %s32_s12 = int_to_ptr.vmem [resolvable:$true] %s31_s12 }
   0xf   :  { %s62_s13 = scalar_lea.vmem %s32_s12, 256  ;;  %p67_p6 = scmp.lt.s32.totalorder %s32_s12, %s32_s12 }
  0x10   :  { %p63_p5 = scmp.ne.s32.totalorder %s32_s12, %s62_s13  ;;  %p68_p7 = scmp.lt.s32.totalorder %s62_s13, %s62_s13 }
  0x12   :  { %p69_p8 = por %p68_p7, %p67_p6 }
  0x14   :  { %p70_p9 = pnand %p69_p8, %p63_p5 }
  0x16   :  { %73 = shalt.err (!%p70_p9)
}
  0x17   :  { %34 = dma.vmem_to_hbm [thread:$0]  %s32_s12, 256, %s105_s1, [#allocation4]  }
  0x18   :  { %84 = dma.done.wait [#allocation4], 256  }
  0x19   :  { %85 = vsyncadd [#allocation4], 4294967040 }
  0x1a   :  { %38 = vsyncpa [#allocation3], 1 }
  0x1b   :  { %39 = vsyncpa [#allocation4], 1 }

</bundles_post_ra>
